<compile_context>
chip_gen: v5e
topology: v5e:2x2
jax: 0.10.0
libtpu: 0.0.40
codegen_flags: <defaults>
</compile_context>

<pallas_src>
import jax
import jax.numpy as jnp
from jax.experimental import pallas as pl
from jax.experimental.pallas import tpu as pltpu


def _round_up(n, m):
    return ((n + m - 1) // m) * m


def _select_vmem(vmem_budget_bytes, vmem_limit_bytes):
    """Generation-aware VMEM budget/limit (explicit args override detection)."""
    if vmem_budget_bytes is not None and vmem_limit_bytes is not None:
        return vmem_budget_bytes, vmem_limit_bytes
    kind = ""
    try:
        kind = jax.devices()[0].device_kind.lower()
    except Exception:
        pass
    if ("v5" in kind) or ("v6" in kind):
        # v5e / v5p / v6e: 128 MiB VMEM per TensorCore -> big tiles.
        return 96 << 20, 100 << 20
    # v7x (64 MiB / TC) and anything unknown: stay conservative.
    return 40 << 20, 48 << 20


def autoencoder_kernel(x_ref,
                       w1_ref, b1_ref,
                       w23_ref, b23_ref,
                       w4_ref, b4_ref,
                       out_ref):
    x = x_ref[...]

    # encoder L1 + ReLU
    h1 = jnp.dot(x, w1_ref[...], preferred_element_type=jnp.float32) + b1_ref[...]
    h1 = jnp.maximum(h1, 0.0)

    # encoder L2 and decoder L3 pre-fused (no activation in between) + ReLU
    h2 = jnp.dot(h1, w23_ref[...], preferred_element_type=jnp.float32) + b23_ref[...]
    h2 = jnp.maximum(h2, 0.0)

    # decoder L4
    y = jnp.dot(h2, w4_ref[...], preferred_element_type=jnp.float32) + b4_ref[...]

    out_ref[...] = y.astype(out_ref.dtype)


def autoencoder_forward(x, params, *, max_tile_rows=1024,
                        vmem_budget_bytes=None, vmem_limit_bytes=None):
    """x: [B, D] float32. params: dict of (in, out) weights / (1, out) biases."""
    B, D = x.shape
    SUB = 8

    w1, b1 = params["w1"], params["b1"]
    w2, b2 = params["w2"], params["b2"]
    w3, b3 = params["w3"], params["b3"]
    w4, b4 = params["w4"], params["b4"]

    # ---- fuse L2/L3 in the wrapper (mathematically identical, one fewer MXU pass) ----
    w23 = w2 @ w3                  # (32, 32)
    b23 = b2 @ w3 + b3             # (1, 32)

    vmem_budget_bytes, vmem_limit_bytes = _select_vmem(vmem_budget_bytes,
                                                       vmem_limit_bytes)

    # Pallas double-buffers every input, even the constant-index_map residents,
    # so the weights are charged twice against the VMEM budget.
    weight_bytes = 4 * (w1.size + b1.size + w23.size + b23.size + w4.size + b4.size)

    # Per batch row in VMEM: double-buffered x tile + double-buffered out tile
    # (16*D bytes) plus f32 intermediates (~D wide output + small hidden activations).
    per_row_bytes = 20 * D + 512

    tb = (vmem_budget_bytes - 2 * weight_bytes) // per_row_bytes
    tb = max(SUB, min(int(tb), max_tile_rows))
    # >= 2 grid steps whenever B allows: lets v7x shard the batch over both
    # TensorCores and gives single-core chips pipelined DMA/compute overlap.
    tb = min(tb, _round_up(pl.cdiv(B, 2), SUB))
    # Never larger than the (rounded-up) batch.
    tb = min(tb, _round_up(B, SUB))
    tb = max(SUB, (tb // SUB) * SUB)

    grid = (pl.cdiv(B, tb),)       # ragged last tile handled by Pallas (masked store)

    tile_spec = pl.BlockSpec((tb, D), lambda i: (i, 0))
    resident = lambda arr: pl.BlockSpec(arr.shape, lambda i: (0, 0))

    flops = 2 * B * (D * 32 + 32 * 32 + 32 * D)
    bytes_accessed = 4 * 2 * B * D + weight_bytes

    out = pl.pallas_call(
        autoencoder_kernel,
        out_shape=jax.ShapeDtypeStruct((B, D), x.dtype),
        grid=grid,
        in_specs=[tile_spec,
                  resident(w1), resident(b1),
                  resident(w23), resident(b23),
                  resident(w4), resident(b4)],
        out_specs=tile_spec,
        compiler_params=pltpu.CompilerParams(
            dimension_semantics=("parallel",),
            vmem_limit_bytes=vmem_limit_bytes),
        cost_estimate=pl.CostEstimate(
            flops=flops, transcendentals=0, bytes_accessed=bytes_accessed),
    )(x, w1, b1, w23, b23, w4, b4)

    return out


def init_params(key, input_dim):
    """PyTorch-Linear-style init (U[-1/sqrt(fan_in), 1/sqrt(fan_in)]).
    Weights returned already transposed to (in, out); biases as (1, out)."""
    dims = [(input_dim, 32), (32, 16), (16, 32), (32, input_dim)]
    params = {}
    for i, (fan_in, fan_out) in enumerate(dims, start=1):
        key, kw, kb = jax.random.split(key, 3)
        bound = 1.0 / (fan_in ** 0.5)
        params[f"w{i}"] = jax.random.uniform(
            kw, (fan_in, fan_out), jnp.float32, minval=-bound, maxval=bound)
        params[f"b{i}"] = jax.random.uniform(
            kb, (1, fan_out), jnp.float32, minval=-bound, maxval=bound)
    return params


def reference_forward(x, p):
    """Unfused reference matching the PyTorch module exactly."""
    h = jnp.maximum(x @ p["w1"] + p["b1"], 0.0)
    z = h @ p["w2"] + p["b2"]
    h = jnp.maximum(z @ p["w3"] + p["b3"], 0.0)
    return h @ p["w4"] + p["b4"]


if __name__ == "__main__":
    input_dim = 64
    batch = 16   # tb=8 -> grid=(2,): both v7x TensorCores get a tile

    key = jax.random.PRNGKey(0)
    key, kx = jax.random.split(key)
    x = jax.random.normal(kx, (batch, input_dim), dtype=jnp.float32)

    params = init_params(key, input_dim)

    out = autoencoder_forward(x, params)
    out = jax.block_until_ready(out)

    ref = reference_forward(x, params)
    assert out.shape == (batch, input_dim)
    # Tolerance slightly loosened vs 1e-5: the w2·w3 pre-fusion reassociates f32 math.
    assert jnp.allclose(out, ref, atol=1e-4, rtol=1e-4), "mismatch vs JAX reference"

    print("KERNEL_OK")
</pallas_src>

<mosaic_0001>
module attributes {stable_mosaic.version = 11 : i64} {
  func.func @autoencoder_kernel(%arg0: i32, %arg1: memref<8x64xf32, #tpu.memory_space<vmem>>, %arg2: memref<64x32xf32, #tpu.memory_space<vmem>>, %arg3: memref<1x32xf32, #tpu.memory_space<vmem>>, %arg4: memref<32x32xf32, #tpu.memory_space<vmem>>, %arg5: memref<1x32xf32, #tpu.memory_space<vmem>>, %arg6: memref<32x64xf32, #tpu.memory_space<vmem>>, %arg7: memref<1x64xf32, #tpu.memory_space<vmem>>, %arg8: memref<8x64xf32, #tpu.memory_space<vmem>>) attributes {dimension_semantics = [#tpu.dimension_semantics<parallel>], iteration_bounds = array<i64: 2>, scalar_prefetch = 0 : i64, scratch_operands = 0 : i64, tpu.core_type = #tpu.core_type<tc>, window_params = [{transform_indices = @transform_0, window_bounds = array<i64: 8, 64>}, {pipeline_mode = #tpu.pipeline_mode<synchronous>, transform_indices = @transform_1, window_bounds = array<i64: 64, 32>}, {pipeline_mode = #tpu.pipeline_mode<synchronous>, transform_indices = @transform_2, window_bounds = array<i64: 1, 32>}, {pipeline_mode = #tpu.pipeline_mode<synchronous>, transform_indices = @transform_3, window_bounds = array<i64: 32, 32>}, {pipeline_mode = #tpu.pipeline_mode<synchronous>, transform_indices = @transform_4, window_bounds = array<i64: 1, 32>}, {pipeline_mode = #tpu.pipeline_mode<synchronous>, transform_indices = @transform_5, window_bounds = array<i64: 32, 64>}, {pipeline_mode = #tpu.pipeline_mode<synchronous>, transform_indices = @transform_6, window_bounds = array<i64: 1, 64>}, {transform_indices = @transform_7, window_bounds = array<i64: 8, 64>}]} {
    %c0 = arith.constant 0 : index
    %c0_0 = arith.constant 0 : index
    %0 = vector.load %arg1[%c0, %c0_0] : memref<8x64xf32, #tpu.memory_space<vmem>>, vector<8x64xf32>
    %c0_1 = arith.constant 0 : index
    %c0_2 = arith.constant 0 : index
    %1 = vector.load %arg2[%c0_1, %c0_2] : memref<64x32xf32, #tpu.memory_space<vmem>>, vector<64x32xf32>
    %cst = arith.constant dense<0.000000e+00> : vector<8x32xf32>
    %2 = tpu.matmul %0, %1, %cst {dimension_numbers = #tpu.dot_dimension_numbers<[1], [0], [0], [1], [0, 0, 1, 1], [], []>} : vector<8x64xf32>, vector<64x32xf32>, vector<8x32xf32> -> vector<8x32xf32>
    %c0_3 = arith.constant 0 : index
    %c0_4 = arith.constant 0 : index
    %3 = vector.load %arg3[%c0_3, %c0_4] : memref<1x32xf32, #tpu.memory_space<vmem>>, vector<1x32xf32>
    %4 = vector.broadcast %3 : vector<1x32xf32> to vector<8x32xf32>
    %5 = arith.addf %2, %4 : vector<8x32xf32>
    %cst_5 = arith.constant 0.000000e+00 : f32
    %6 = vector.broadcast %cst_5 : f32 to vector<8x32xf32>
    %7 = arith.maximumf %5, %6 : vector<8x32xf32>
    %c0_6 = arith.constant 0 : index
    %c0_7 = arith.constant 0 : index
    %8 = vector.load %arg4[%c0_6, %c0_7] : memref<32x32xf32, #tpu.memory_space<vmem>>, vector<32x32xf32>
    %cst_8 = arith.constant dense<0.000000e+00> : vector<8x32xf32>
    %9 = tpu.matmul %7, %8, %cst_8 {dimension_numbers = #tpu.dot_dimension_numbers<[1], [0], [0], [1], [0, 0, 1, 1], [], []>} : vector<8x32xf32>, vector<32x32xf32>, vector<8x32xf32> -> vector<8x32xf32>
    %c0_9 = arith.constant 0 : index
    %c0_10 = arith.constant 0 : index
    %10 = vector.load %arg5[%c0_9, %c0_10] : memref<1x32xf32, #tpu.memory_space<vmem>>, vector<1x32xf32>
    %11 = vector.broadcast %10 : vector<1x32xf32> to vector<8x32xf32>
    %12 = arith.addf %9, %11 : vector<8x32xf32>
    %cst_11 = arith.constant 0.000000e+00 : f32
    %13 = vector.broadcast %cst_11 : f32 to vector<8x32xf32>
    %14 = arith.maximumf %12, %13 : vector<8x32xf32>
    %c0_12 = arith.constant 0 : index
    %c0_13 = arith.constant 0 : index
    %15 = vector.load %arg6[%c0_12, %c0_13] : memref<32x64xf32, #tpu.memory_space<vmem>>, vector<32x64xf32>
    %cst_14 = arith.constant dense<0.000000e+00> : vector<8x64xf32>
    %16 = tpu.matmul %14, %15, %cst_14 {dimension_numbers = #tpu.dot_dimension_numbers<[1], [0], [0], [1], [0, 0, 1, 1], [], []>} : vector<8x32xf32>, vector<32x64xf32>, vector<8x64xf32> -> vector<8x64xf32>
    %c0_15 = arith.constant 0 : index
    %c0_16 = arith.constant 0 : index
    %17 = vector.load %arg7[%c0_15, %c0_16] : memref<1x64xf32, #tpu.memory_space<vmem>>, vector<1x64xf32>
    %18 = vector.broadcast %17 : vector<1x64xf32> to vector<8x64xf32>
    %19 = arith.addf %16, %18 : vector<8x64xf32>
    %c0_17 = arith.constant 0 : index
    %c0_18 = arith.constant 0 : index
    %20 = vector.load %arg8[%c0_17, %c0_18] : memref<8x64xf32, #tpu.memory_space<vmem>>, vector<8x64xf32>
    tpu.vector_store %arg8[%c0_17, %c0_18], %19 {strides = array<i32>} : memref<8x64xf32, #tpu.memory_space<vmem>>, vector<8x64xf32>,
    return
  }
  func.func @transform_0(%arg0: i32) -> (i32, i32) {
    %c0_i32 = arith.constant 0 : i32
    %c0_i32_0 = arith.constant 0 : i32
    return %arg0, %c0_i32 : i32, i32
  }
  func.func @transform_1(%arg0: i32) -> (i32, i32) {
    %c0_i32 = arith.constant 0 : i32
    %c0_i32_0 = arith.constant 0 : i32
    %c0_i32_1 = arith.constant 0 : i32
    return %c0_i32, %c0_i32_0 : i32, i32
  }
  func.func @transform_2(%arg0: i32) -> (i32, i32) {
    %c0_i32 = arith.constant 0 : i32
    %c0_i32_0 = arith.constant 0 : i32
    %c0_i32_1 = arith.constant 0 : i32
    return %c0_i32, %c0_i32_0 : i32, i32
  }
  func.func @transform_3(%arg0: i32) -> (i32, i32) {
    %c0_i32 = arith.constant 0 : i32
    %c0_i32_0 = arith.constant 0 : i32
    %c0_i32_1 = arith.constant 0 : i32
    return %c0_i32, %c0_i32_0 : i32, i32
  }
  func.func @transform_4(%arg0: i32) -> (i32, i32) {
    %c0_i32 = arith.constant 0 : i32
    %c0_i32_0 = arith.constant 0 : i32
    %c0_i32_1 = arith.constant 0 : i32
    return %c0_i32, %c0_i32_0 : i32, i32
  }
  func.func @transform_5(%arg0: i32) -> (i32, i32) {
    %c0_i32 = arith.constant 0 : i32
    %c0_i32_0 = arith.constant 0 : i32
    %c0_i32_1 = arith.constant 0 : i32
    return %c0_i32, %c0_i32_0 : i32, i32
  }
  func.func @transform_6(%arg0: i32) -> (i32, i32) {
    %c0_i32 = arith.constant 0 : i32
    %c0_i32_0 = arith.constant 0 : i32
    %c0_i32_1 = arith.constant 0 : i32
    return %c0_i32, %c0_i32_0 : i32, i32
  }
  func.func @transform_7(%arg0: i32) -> (i32, i32) {
    %c0_i32 = arith.constant 0 : i32
    %c0_i32_0 = arith.constant 0 : i32
    return %arg0, %c0_i32 : i32, i32
  }
}

</mosaic_0001>

<bundles_post_ra>
// kernel: tpu_custom_call.1
= control target key start
LH: loop header
LB: loop body
LE: loop exit
PB: predicated region body
PF: predicated region fallthrough
CT: control target
= control target key end

     0   :  { %12 = vsyncpa [#allocation3], 0  ;;  %s755_s0 = inlined_call_operand.vmem [shape: f32[16,64], index: 0, kind: input, shape index: {}]   ;;  %s756_s1 = inlined_call_operand.vmem [shape: f32[64,32], index: 1, kind: input, shape index: {}]   ;;  %s757_s2 = inlined_call_operand.vmem [shape: f32[1,32], index: 2, kind: input, shape index: {}]   ;;  %s758_s3 = inlined_call_operand.vmem [shape: f32[32,32], index: 3, kind: input, shape index: {}]   ;;  %s759_s4 = inlined_call_operand.vmem [shape: f32[1,32], index: 4, kind: input, shape index: {}]   ;;  %s760_s5 = inlined_call_operand.vmem [shape: f32[32,64], index: 5, kind: input, shape index: {}]   ;;  %s761_s6 = inlined_call_operand.vmem [shape: f32[1,64], index: 6, kind: input, shape index: {}]   ;;  %s762_s7 = inlined_call_operand.hbm [shape: f32[16,64], index: 7, kind: output, shape index: {}]  }
   0x1   :  { %14 = vsyncpa [#allocation3 + $0x1], 0  ;;  %s611_s24 = smov 0   ;;  %s613_s25 = smov 0  }
   0x2   :  { %s615_s26 = smov 0   ;;  %s617_s27 = smov 0  }
   0x3 LB: > { %s632_s28 = sadd.s32 4294967295, %s569_s27   ;;  %s452_s29 = sadd.s32 4294967294, %s569_s27   ;;  %s569_s27 = sphi %s617_s27, %s768_s27   ;;  %s565_s26 = sphi %s615_s26, %s767_s26   ;;  %s561_s25 = sphi %s613_s25, %s766_s25   ;;  %s557_s24 = sphi %s611_s24, %s765_s24  }
   0x4   : > { %s636_s30 = sadd.s32 1, %s569_s27   ;;  %s179_s8 = sadd.s32 1, %s565_s26 }
   0x5   : > { %s176_s9 = ssub.s32 %s569_s27, %s636_s30  ;;  %p189_p0 = scmp.ne.s32.totalorder %s565_s26, %s561_s25 }
   0x6   : > { %p177_p1 = scmp.eq.s32.totalorder %s176_s9, 0  ;;  %p190_p2 = scmp.eq.s32.totalorder %s632_s28, 1 }
   0x7   : > { %p195_p3 = scmp.ne.s32.totalorder %s561_s25, %s557_s24  ;;  %p196_p4 = scmp.eq.s32.totalorder %s452_s29, 1 }
   0x8   : > { %s647_s10 = scalar_select %p177_p1, %s565_s26, %s179_s8  }
   0x9   : > { %p649_p5 = por %p190_p2, %p189_p0  ;;  %p653_p6 = por %p196_p4, %p195_p3 }
   0xa   : > { %p455_p7 = scmp.ge.s32.totalorder %s569_s27, 1  ;;  %p239_p8 = scmp.lt.s32.totalorder %s569_s27, 3 }
   0xc   : > { %p240_p9 = pnand %p455_p7, %p239_p8 }
   0xd   : > { %p270_p10 = scmp.lt.s32.totalorder (!%p240_p9), %s632_s28, 1  ;;  %s462_s14 = sshll.u32 (!%p240_p9), %s632_s28, 3 }
   0xe   : > { %243 = sbr.rel (%p240_p9) target bundleno = 432 (0x1b0), region = 48  ;;  %s388_s17 = scalar_lea.hbm (!%p240_p9), %s762_s7, %s462_s14 }
  0x13   : > { %v282_v0 = vld [vmem:[%s756_s1 + $0x38] sm:$0xff]  ;;  %v281_v1 = vld [vmem:[%s756_s1 + $0x30] sm:$0xff]  ;;  %v280_v2 = vld [vmem:[%s756_s1 + $0x28] sm:$0xff]  ;;  %s271_s21 = scalar_select %p270_p10, %s632_s28, 1  ;;  %vm287_vm0 = vcmask 523264   ;;  %vm320_vm1 = vcmask 261120  }
  0x14   : > { %299 = vmatpush.msra.mxu0 %v282_v0  ;;  %v315_v3 = vld [vmem:[%s758_s3 + $0x18] sm:$0xff]  ;;  %v279_v4 = vld [vmem:[%s756_s1 + $0x20] sm:$0xff]  ;;  %v277_v6 = vld [vmem:[%s756_s1 + $0x10] sm:$0xff] }
  0x15   : > { %336 = vmatpush.msra.mxu1 %v315_v3  ;;  %v278_v5 = vld [vmem:[%s756_s1 + $0x18] sm:$0xff]  ;;  %s457_s9 = sshll.u32 %s271_s21, 3  ;;  %v276_v7 = vld [vmem:[%s756_s1 + $0x8] sm:$0xff]  ;;  %v275_v8 = vld [vmem:[%s756_s1] sm:$0xff]  ;;  %s392_s21 = sshll.u32 %s388_s17, 4  ;;  %s393_s21 = int_to_ptr.hbm [resolvable:$true] %s392_s21 }
  0x16   : > { %300 = vmatpush.msra.mxu0 %v281_v1  ;;  %s273_s19 = scalar_lea.vmem %s755_s0, %s457_s9  ;;  %v314_v10 = vld [vmem:[%s758_s3 + $0x10] sm:$0xff]  ;;  %v313_v11 = vld [vmem:[%s758_s3 + $0x8] sm:$0xff]  ;;  %v312_v12 = vld [vmem:[%s758_s3] sm:$0xff]  ;;  %s267_s9 = sand.u32 1, %s561_s25  }
  0x17   : > { %v274_v9 = vld [vmem:[%s273_s19] sm:$0xff]  ;;  %337 = vmatpush.msra.mxu1 %v314_v10  ;;  %v348_v13 = vld [vmem:[%s760_s5 + $0x18] sm:$0xff]  ;;  %v347_v18 = vld [vmem:[%s760_s5 + $0x10] sm:$0xff]  ;;  %s456_s13 = sshll.u32 %s267_s9, 3  ;;  %s378_s23 = scalar_lea.sflag [#allocation3], %s267_s9 }
  0x18   : > { %301 = vmatpush.msra.mxu0 %v280_v2  ;;  %368 = vmatpush.msra.mxu2 %v348_v13  ;;  %v504_v14 = vld [vmem:[%s757_s2] ss:$0 sm:$0xff]  ;;  %v346_v19 = vld [vmem:[%s760_s5 + $0x8] sm:$0xff]  ;;  %s269_s20 = scalar_lea.vmem [#allocation2], %s456_s13  ;;  %s521_s28 = sshra.s32 %s393_s21, 4  ;;  %s522_s28 = int_to_ptr.hbm [resolvable:$true] %s521_s28 }
  0x19   : > { %338 = vmatpush.msra.mxu1 %v313_v11  ;;  %v345_v20 = vld [vmem:[%s760_s5] sm:$0xff]  ;;  %s390_s22 = sshll.u32 %s269_s20, 4  ;;  %s523_s29 = scalar_lea.hbm %s522_s28, 8  ;;  %s391_s22 = int_to_ptr.vmem [resolvable:$true] %s390_s22 }
  0x1a   : > { %302 = vmatpush.msra.mxu0 %v279_v4  ;;  %369 = vmatpush.msra.mxu2 %v347_v18  ;;  %v505_v21 = vld [vmem:[%s759_s4] ss:$0 sm:$0xff]  ;;  %p524_p11 = scmp.ne.s32.totalorder %s522_s28, %s523_s29  ;;  %s527_s13 = scalar_lea.hbm %s762_s7, 16 }
  0x1b   : > { %339 = vmatpush.msra.mxu1 %v312_v12  ;;  %v506_v25 = vld [vmem:[%s761_s6] ss:$0 sm:$0xff]  ;;  %p528_p0 = scmp.lt.s32.totalorder %s522_s28, %s762_s7  ;;  %p529_p1 = scmp.lt.s32.totalorder %s527_s13, %s523_s29 }
  0x1c   : > { %303 = vmatpush.msra.mxu0 %v278_v5  ;;  %370 = vmatpush.msra.mxu2 %v346_v19  ;;  %p525_p12 = pnand %p524_p11, %p649_p5 }
  0x1d   : > { %p530_p2 = por %p529_p1, %p528_p0 }
  0x1e   : > { %304 = vmatpush.msra.mxu0 %v277_v6  ;;  %371 = vmatpush.msra.mxu2 %v345_v20  ;;  %p526_p13 = pneg %p525_p12 }
  0x20   : > { %305 = vmatpush.msra.mxu0 %v276_v7  ;;  %p531_p3 = pnand %p530_p2, %p526_p13 }
  0x22   : > { %306 = vmatpush.msra.mxu0 %v275_v8 }
  0x23   : > { %458 = vmatmul.msk.f32.vlgmr.msra.gmra.mxu0 %vm287_vm0, %v274_v9 }
  0xa0   : > { %v308_v15 = vpop.f32.mrf.mxu0 }
  0xa1   : > { %v309_v16 = vadd.f32 %v504_v14, %v308_v15 }
  0xa3   : > { %v311_v17 = vmax.f32 %v309_v16, 0.0 }
  0xa5   : > { %459 = vmatmul.msk.f32.vlgmr.msra.gmra.mxu1 %vm320_vm1, %v311_v17 }
 0x122   : > { %v341_v22 = vpop.f32.mrf.mxu1 }
 0x123   : > { %v342_v23 = vadd.f32 %v505_v21, %v341_v22 }
 0x125   : > { %v344_v24 = vmax.f32 %v342_v23, 0.0 }
 0x127   : > { %460 = vmatmul.msk.f32.vlgmr.msra.gmra.mxu2 %vm320_vm1, %v344_v24 }
 0x1aa   : > { %v373_v26 = vpop.f32.mrf.mxu2 }
 0x1ab   : > { %v374_v27 = vadd.f32 %v506_v25, %v373_v26 }
 0x1ad   : > { %376 = vst.msk [vmem:[%s269_s20] sm:$0xff] %vm287_vm0, %v374_v27 }
 0x1ae   : > { %534 = shalt.err (!%p531_p3)
}
 0x1af   : > { %465 = dma.vmem_to_hbm [thread:$0]  (%p649_p5), %s391_s22, 128, %s393_s21, %s378_s23  }
 0x1b0 PF: > { %p471_p4 = scmp.ge.s32.totalorder %s569_s27, 2  ;;  %s404_s9 = sand.u32 1, %s557_s24  }
 0x1b1   : > { %s405_s17 = scalar_lea.sflag [#allocation3], %s404_s9 }
 0x1b2   : > { %p468_p7 = pnand %p471_p4, %p653_p6 }
 0x1b4   : > { %p469_p8 = pneg %p468_p7 }
 0x1b6   : > { %552 = dma.done.wait (%p469_p8), %s405_s17, 128  }
 0x1b7   : > { %554 = vsyncadd (%p469_p8), %s405_s17, 4294967168  ;;  %p17_p9 = scmp.ge.s32.totalorder %s636_s30, 4   ;;  %s765_s24 = smov %s561_s25 }
 0x1b8   : > { %s766_s25 = smov %s565_s26  ;;  %s767_s26 = smov %s647_s10 }
 0x1b9   : > { %s768_s27 = smov %s636_s30  ;;  %19 = sbr.rel (!%p17_p9) target bundleno = 3 (0x3), region = 83 }
 0x1be   :  { %411 = vsyncpa [#allocation3], 1 }
 0x1bf   :  { %413 = vsyncpa [#allocation3 + $0x1], 1 }

</bundles_post_ra>
